<compile_context>
chip_gen: v5e
topology: v5e:2x2
jax: 0.10.0
libtpu: 0.0.40
codegen_flags: <defaults>
</compile_context>

<pallas_src>
import functools

import jax
import jax.numpy as jnp
from jax import lax
from jax.experimental import pallas as pl
from jax.experimental.pallas import tpu as pltpu


def _attention_kernel(*refs, scaling, num_heads, head_dim, values_head_dim,
                      has_mask, mask_heads):
    if has_mask:
        hs_ref, k_ref, v_ref, mask_ref, w_ref, b_ref, o_ref = refs
    else:
        hs_ref, k_ref, v_ref, w_ref, b_ref, o_ref = refs
        mask_ref = None

    hs = hs_ref[0].astype(jnp.float32) * scaling      # (Q, embed_dim)
    ks = k_ref[0].astype(jnp.float32)                 # (K, embed_dim)
    vs = v_ref[0].astype(jnp.float32)                 # (K, output_dim)

    # TODO(synk): for v6e/v7x, casting q/k/p to bf16 for the MXU matmuls
    # (keeping f32 accumulation) would run the MXU at peak, at the cost of
    # deviating from the f32 torch reference; kept f32 here for tolerance.
    head_outs = []
    for h in range(num_heads):                        # static unroll over heads
        q_h = hs[:, h * head_dim:(h + 1) * head_dim]              # (Q, hd)
        k_h = ks[:, h * head_dim:(h + 1) * head_dim]              # (K, hd)
        # scores (Q, K): contract over head_dim, K on the lane axis.
        s = lax.dot_general(q_h, k_h, (((1,), (1,)), ((), ())),
                            preferred_element_type=jnp.float32)
        if has_mask:
            m = mask_ref[0, 0] if mask_heads == 1 else mask_ref[0, h]
            s = s + m.astype(jnp.float32)
        # numerically stable softmax in f32 (matches torch softmax(dtype=f32));
        # the normalization is folded in after the PV matmul (Q*vd mults).
        s = s - jnp.max(s, axis=-1, keepdims=True)
        p = jnp.exp(s)
        inv = pl.reciprocal(jnp.sum(p, axis=-1, keepdims=True), approx=False)
        # TODO(synk): attention_dropout skipped (identity in eval mode).
        v_h = vs[:, h * values_head_dim:(h + 1) * values_head_dim]  # (K, vd)
        ho = jnp.dot(p, v_h, preferred_element_type=jnp.float32) * inv
        head_outs.append(ho)                                        # (Q, vd)

    # Merge heads -> lane-dense (Q, output_dim) slab, then a single output
    # projection matmul contracting over output_dim with the bias folded in.
    attn = jnp.concatenate(head_outs, axis=-1)                      # (Q, D)
    out = jnp.dot(attn, w_ref[...],
                  preferred_element_type=jnp.float32) + b_ref[...]
    o_ref[0] = out.astype(o_ref.dtype)


def dab_detr_attention(hidden_states, key_states, value_states,
                       proj_weight, proj_bias, attention_mask=None,
                       *, num_heads):
    """DabDetrAttention forward.

    hidden_states: (B, Q, embed_dim)     (queries, pre-projected)
    key_states:    (B, K, embed_dim)
    value_states:  (B, K, output_dim)
    proj_weight:   (output_dim, output_dim)  torch Linear layout (out, in)
    proj_bias:     (output_dim,)
    attention_mask: optional additive mask, (B, 1, Q, K), (B, H, Q, K) or (B, Q, K).
    Returns (B, Q, output_dim).
    """
    B, Q, embed_dim = hidden_states.shape
    _, K, _ = key_states.shape
    output_dim = value_states.shape[-1]
    head_dim = embed_dim // num_heads
    values_head_dim = output_dim // num_heads
    scaling = float(head_dim) ** -0.5

    # y = x @ W.T + b   (torch Linear); pass W.T so it is resident in VMEM.
    w_t = proj_weight.T                                  # (output_dim, output_dim)
    b_row = proj_bias.reshape(1, output_dim)

    has_mask = attention_mask is not None
    mask_heads = 1

    in_specs = [
        pl.BlockSpec((1, Q, embed_dim), lambda b: (b, 0, 0)),
        pl.BlockSpec((1, K, embed_dim), lambda b: (b, 0, 0)),
        pl.BlockSpec((1, K, output_dim), lambda b: (b, 0, 0)),
    ]
    args = [hidden_states, key_states, value_states]
    if has_mask:
        mask = attention_mask
        if mask.ndim == 3:                       # (B, Q, K) -> (B, 1, Q, K)
            assert mask.shape[0] == B, "3-D attention_mask must be (B, Q, K)"
            mask = mask[:, None]
        mask_heads = mask.shape[1]
        assert mask_heads in (1, num_heads), "mask head dim must be 1 or num_heads"
        in_specs.append(pl.BlockSpec((1, mask_heads, Q, K),
                                     lambda b: (b, 0, 0, 0)))
        args.append(mask)
    # Projection weight/bias: constant index_map -> DMA'd once, stays resident.
    in_specs += [
        pl.BlockSpec((output_dim, output_dim), lambda b: (0, 0)),
        pl.BlockSpec((1, output_dim), lambda b: (0, 0)),
    ]
    args += [w_t, b_row]

    kernel = functools.partial(
        _attention_kernel, scaling=scaling, num_heads=num_heads,
        head_dim=head_dim, values_head_dim=values_head_dim,
        has_mask=has_mask, mask_heads=mask_heads)

    out = pl.pallas_call(
        kernel,
        out_shape=jax.ShapeDtypeStruct((B, Q, output_dim), hidden_states.dtype),
        grid_spec=pltpu.PrefetchScalarGridSpec(
            num_scalar_prefetch=0,
            grid=(B,),
            in_specs=in_specs,
            out_specs=pl.BlockSpec((1, Q, output_dim), lambda b: (b, 0, 0)),
        ),
        compiler_params=pltpu.CompilerParams(
            dimension_semantics=("parallel",)),
    )(*args)
    return out


def _reference(hidden_states, key_states, value_states, proj_weight, proj_bias,
               attention_mask, num_heads):
    B, Q, E = hidden_states.shape
    K = key_states.shape[1]
    D = value_states.shape[-1]
    hd = E // num_heads
    vd = D // num_heads
    scaling = float(hd) ** -0.5
    q = (hidden_states * scaling).reshape(B, Q, num_heads, hd).transpose(0, 2, 1, 3)
    k = key_states.reshape(B, K, num_heads, hd).transpose(0, 2, 1, 3)
    v = value_states.reshape(B, K, num_heads, vd).transpose(0, 2, 1, 3)
    w = jnp.einsum('bhqd,bhkd->bhqk', q, k)
    if attention_mask is not None:
        w = w + attention_mask
    w = jax.nn.softmax(w.astype(jnp.float32), axis=-1)
    o = jnp.einsum('bhqk,bhkd->bhqd', w, v)
    o = o.transpose(0, 2, 1, 3).reshape(B, Q, D)
    return o @ proj_weight.T + proj_bias


if __name__ == "__main__":
    key = jax.random.PRNGKey(0)
    kh, kk, kv, kw, kb = jax.random.split(key, 5)

    # Cross-attention config: hidden_size=32, heads=4 -> embed_dim=64 (q/k),
    # output_dim=32 (v / output), head_dim=16, values_head_dim=8.
    hidden_size = 32
    num_heads = 4
    embed_dim = hidden_size * 2
    output_dim = hidden_size
    B, Q, K = 2, 8, 16

    hidden_states = jax.random.normal(kh, (B, Q, embed_dim), dtype=jnp.float32)
    key_states = jax.random.normal(kk, (B, K, embed_dim), dtype=jnp.float32)
    value_states = jax.random.normal(kv, (B, K, output_dim), dtype=jnp.float32)

    proj_weight = 0.1 * jax.random.normal(kw, (output_dim, output_dim),
                                          dtype=jnp.float32)
    proj_bias = 0.1 * jax.random.normal(kb, (output_dim,), dtype=jnp.float32)

    # Additive attention mask: mask out the last 3 keys (padding-style).
    attention_mask = jnp.zeros((B, 1, Q, K), dtype=jnp.float32)
    attention_mask = attention_mask.at[:, :, :, -3:].set(-1e9)

    y = dab_detr_attention(hidden_states, key_states, value_states,
                           proj_weight, proj_bias, attention_mask,
                           num_heads=num_heads)
    y = jax.block_until_ready(y)

    y_ref = _reference(hidden_states, key_states, value_states,
                       proj_weight, proj_bias, attention_mask, num_heads)

    assert y.shape == (B, Q, output_dim)
    assert jnp.allclose(y, y_ref, atol=2e-5, rtol=2e-5), "mismatch vs reference"

    # Also exercise the mask-free path.
    y2 = dab_detr_attention(hidden_states, key_states, value_states,
                            proj_weight, proj_bias, None, num_heads=num_heads)
    y2 = jax.block_until_ready(y2)
    y2_ref = _reference(hidden_states, key_states, value_states,
                        proj_weight, proj_bias, None, num_heads)
    assert jnp.allclose(y2, y2_ref, atol=2e-5, rtol=2e-5), "mismatch (no mask)"

    print("KERNEL_OK")
</pallas_src>

<mosaic_0001>
module attributes {stable_mosaic.version = 11 : i64} {
  func.func @_attention_kernel(%arg0: i32, %arg1: memref<1x8x64xf32, #tpu.memory_space<vmem>>, %arg2: memref<1x16x64xf32, #tpu.memory_space<vmem>>, %arg3: memref<1x16x32xf32, #tpu.memory_space<vmem>>, %arg4: memref<1x1x8x16xf32, #tpu.memory_space<vmem>>, %arg5: memref<32x32xf32, #tpu.memory_space<vmem>>, %arg6: memref<1x32xf32, #tpu.memory_space<vmem>>, %arg7: memref<1x8x32xf32, #tpu.memory_space<vmem>>) attributes {dimension_semantics = [#tpu.dimension_semantics<parallel>], iteration_bounds = array<i64: 2>, scalar_prefetch = 0 : i64, scratch_operands = 0 : i64, tpu.core_type = #tpu.core_type<tc>, window_params = [{transform_indices = @transform_0, window_bounds = array<i64: 1, 8, 64>}, {transform_indices = @transform_1, window_bounds = array<i64: 1, 16, 64>}, {transform_indices = @transform_2, window_bounds = array<i64: 1, 16, 32>}, {transform_indices = @transform_3, window_bounds = array<i64: 1, 1, 8, 16>}, {pipeline_mode = #tpu.pipeline_mode<synchronous>, transform_indices = @transform_4, window_bounds = array<i64: 32, 32>}, {pipeline_mode = #tpu.pipeline_mode<synchronous>, transform_indices = @transform_5, window_bounds = array<i64: 1, 32>}, {transform_indices = @transform_6, window_bounds = array<i64: 1, 8, 32>}]} {
    %c0 = arith.constant 0 : index
    %c0_0 = arith.constant 0 : index
    %c0_1 = arith.constant 0 : index
    %0 = vector.load %arg1[%c0, %c0_0, %c0_1] : memref<1x8x64xf32, #tpu.memory_space<vmem>>, vector<1x8x64xf32>
    %1 = vector.shape_cast %0 : vector<1x8x64xf32> to vector<8x64xf32>
    %cst = arith.constant 2.500000e-01 : f32
    %2 = vector.broadcast %cst : f32 to vector<8x64xf32>
    %3 = arith.mulf %1, %2 : vector<8x64xf32>
    %c0_2 = arith.constant 0 : index
    %c0_3 = arith.constant 0 : index
    %c0_4 = arith.constant 0 : index
    %4 = vector.load %arg2[%c0_2, %c0_3, %c0_4] : memref<1x16x64xf32, #tpu.memory_space<vmem>>, vector<1x16x64xf32>
    %5 = vector.shape_cast %4 : vector<1x16x64xf32> to vector<16x64xf32>
    %c0_5 = arith.constant 0 : index
    %c0_6 = arith.constant 0 : index
    %c0_7 = arith.constant 0 : index
    %6 = vector.load %arg3[%c0_5, %c0_6, %c0_7] : memref<1x16x32xf32, #tpu.memory_space<vmem>>, vector<1x16x32xf32>
    %7 = vector.shape_cast %6 : vector<1x16x32xf32> to vector<16x32xf32>
    %8 = vector.extract_strided_slice %3 {offsets = [0, 0], sizes = [8, 16], strides = [1, 1]} : vector<8x64xf32> to vector<8x16xf32>
    %9 = vector.extract_strided_slice %5 {offsets = [0, 0], sizes = [16, 16], strides = [1, 1]} : vector<16x64xf32> to vector<16x16xf32>
    %cst_8 = arith.constant dense<0.000000e+00> : vector<8x16xf32>
    %10 = tpu.matmul %8, %9, %cst_8 {dimension_numbers = #tpu.dot_dimension_numbers<[1], [1], [0], [0], [0, 0, 1, 0], [], []>} : vector<8x16xf32>, vector<16x16xf32>, vector<8x16xf32> -> vector<8x16xf32>
    %c0_9 = arith.constant 0 : index
    %c0_10 = arith.constant 0 : index
    %c0_11 = arith.constant 0 : index
    %c0_12 = arith.constant 0 : index
    %11 = vector.load %arg4[%c0_9, %c0_10, %c0_11, %c0_12] : memref<1x1x8x16xf32, #tpu.memory_space<vmem>>, vector<1x1x8x16xf32>
    %12 = vector.shape_cast %11 : vector<1x1x8x16xf32> to vector<8x16xf32>
    %13 = arith.addf %10, %12 : vector<8x16xf32>
    %cst_13 = arith.constant dense<0xFF800000> : vector<8xf32>
    %14 = vector.multi_reduction <maximumf>, %13, %cst_13 [1] : vector<8x16xf32> to vector<8xf32>
    %15 = vector.shape_cast %14 : vector<8xf32> to vector<8x1xf32>
    %16 = vector.broadcast %15 : vector<8x1xf32> to vector<8x16xf32>
    %17 = arith.subf %13, %16 : vector<8x16xf32>
    %18 = math.exp %17 : vector<8x16xf32>
    %cst_14 = arith.constant dense<0.000000e+00> : vector<8xf32>
    %19 = vector.multi_reduction <add>, %18, %cst_14 [1] : vector<8x16xf32> to vector<8xf32>
    %20 = vector.shape_cast %19 : vector<8xf32> to vector<8x1xf32>
    %21 = tpu.reciprocal %20 : vector<8x1xf32> -> vector<8x1xf32>
    %22 = vector.extract_strided_slice %7 {offsets = [0, 0], sizes = [16, 8], strides = [1, 1]} : vector<16x32xf32> to vector<16x8xf32>
    %cst_15 = arith.constant dense<0.000000e+00> : vector<8x8xf32>
    %23 = tpu.matmul %18, %22, %cst_15 {dimension_numbers = #tpu.dot_dimension_numbers<[1], [0], [0], [1], [0, 0, 1, 1], [], []>} : vector<8x16xf32>, vector<16x8xf32>, vector<8x8xf32> -> vector<8x8xf32>
    %24 = vector.broadcast %21 : vector<8x1xf32> to vector<8x8xf32>
    %25 = arith.mulf %23, %24 : vector<8x8xf32>
    %26 = vector.extract_strided_slice %3 {offsets = [0, 16], sizes = [8, 16], strides = [1, 1]} : vector<8x64xf32> to vector<8x16xf32>
    %27 = vector.extract_strided_slice %5 {offsets = [0, 16], sizes = [16, 16], strides = [1, 1]} : vector<16x64xf32> to vector<16x16xf32>
    %cst_16 = arith.constant dense<0.000000e+00> : vector<8x16xf32>
    %28 = tpu.matmul %26, %27, %cst_16 {dimension_numbers = #tpu.dot_dimension_numbers<[1], [1], [0], [0], [0, 0, 1, 0], [], []>} : vector<8x16xf32>, vector<16x16xf32>, vector<8x16xf32> -> vector<8x16xf32>
    %c0_17 = arith.constant 0 : index
    %c0_18 = arith.constant 0 : index
    %c0_19 = arith.constant 0 : index
    %c0_20 = arith.constant 0 : index
    %29 = vector.load %arg4[%c0_17, %c0_18, %c0_19, %c0_20] : memref<1x1x8x16xf32, #tpu.memory_space<vmem>>, vector<1x1x8x16xf32>
    %30 = vector.shape_cast %29 : vector<1x1x8x16xf32> to vector<8x16xf32>
    %31 = arith.addf %28, %30 : vector<8x16xf32>
    %cst_21 = arith.constant dense<0xFF800000> : vector<8xf32>
    %32 = vector.multi_reduction <maximumf>, %31, %cst_21 [1] : vector<8x16xf32> to vector<8xf32>
    %33 = vector.shape_cast %32 : vector<8xf32> to vector<8x1xf32>
    %34 = vector.broadcast %33 : vector<8x1xf32> to vector<8x16xf32>
    %35 = arith.subf %31, %34 : vector<8x16xf32>
    %36 = math.exp %35 : vector<8x16xf32>
    %cst_22 = arith.constant dense<0.000000e+00> : vector<8xf32>
    %37 = vector.multi_reduction <add>, %36, %cst_22 [1] : vector<8x16xf32> to vector<8xf32>
    %38 = vector.shape_cast %37 : vector<8xf32> to vector<8x1xf32>
    %39 = tpu.reciprocal %38 : vector<8x1xf32> -> vector<8x1xf32>
    %40 = vector.extract_strided_slice %7 {offsets = [0, 8], sizes = [16, 8], strides = [1, 1]} : vector<16x32xf32> to vector<16x8xf32>
    %cst_23 = arith.constant dense<0.000000e+00> : vector<8x8xf32>
    %41 = tpu.matmul %36, %40, %cst_23 {dimension_numbers = #tpu.dot_dimension_numbers<[1], [0], [0], [1], [0, 0, 1, 1], [], []>} : vector<8x16xf32>, vector<16x8xf32>, vector<8x8xf32> -> vector<8x8xf32>
    %42 = vector.broadcast %39 : vector<8x1xf32> to vector<8x8xf32>
    %43 = arith.mulf %41, %42 : vector<8x8xf32>
    %44 = vector.extract_strided_slice %3 {offsets = [0, 32], sizes = [8, 16], strides = [1, 1]} : vector<8x64xf32> to vector<8x16xf32>
    %45 = vector.extract_strided_slice %5 {offsets = [0, 32], sizes = [16, 16], strides = [1, 1]} : vector<16x64xf32> to vector<16x16xf32>
    %cst_24 = arith.constant dense<0.000000e+00> : vector<8x16xf32>
    %46 = tpu.matmul %44, %45, %cst_24 {dimension_numbers = #tpu.dot_dimension_numbers<[1], [1], [0], [0], [0, 0, 1, 0], [], []>} : vector<8x16xf32>, vector<16x16xf32>, vector<8x16xf32> -> vector<8x16xf32>
    %c0_25 = arith.constant 0 : index
    %c0_26 = arith.constant 0 : index
    %c0_27 = arith.constant 0 : index
    %c0_28 = arith.constant 0 : index
    %47 = vector.load %arg4[%c0_25, %c0_26, %c0_27, %c0_28] : memref<1x1x8x16xf32, #tpu.memory_space<vmem>>, vector<1x1x8x16xf32>
    %48 = vector.shape_cast %47 : vector<1x1x8x16xf32> to vector<8x16xf32>
    %49 = arith.addf %46, %48 : vector<8x16xf32>
    %cst_29 = arith.constant dense<0xFF800000> : vector<8xf32>
    %50 = vector.multi_reduction <maximumf>, %49, %cst_29 [1] : vector<8x16xf32> to vector<8xf32>
    %51 = vector.shape_cast %50 : vector<8xf32> to vector<8x1xf32>
    %52 = vector.broadcast %51 : vector<8x1xf32> to vector<8x16xf32>
    %53 = arith.subf %49, %52 : vector<8x16xf32>
    %54 = math.exp %53 : vector<8x16xf32>
    %cst_30 = arith.constant dense<0.000000e+00> : vector<8xf32>
    %55 = vector.multi_reduction <add>, %54, %cst_30 [1] : vector<8x16xf32> to vector<8xf32>
    %56 = vector.shape_cast %55 : vector<8xf32> to vector<8x1xf32>
    %57 = tpu.reciprocal %56 : vector<8x1xf32> -> vector<8x1xf32>
    %58 = vector.extract_strided_slice %7 {offsets = [0, 16], sizes = [16, 8], strides = [1, 1]} : vector<16x32xf32> to vector<16x8xf32>
    %cst_31 = arith.constant dense<0.000000e+00> : vector<8x8xf32>
    %59 = tpu.matmul %54, %58, %cst_31 {dimension_numbers = #tpu.dot_dimension_numbers<[1], [0], [0], [1], [0, 0, 1, 1], [], []>} : vector<8x16xf32>, vector<16x8xf32>, vector<8x8xf32> -> vector<8x8xf32>
    %60 = vector.broadcast %57 : vector<8x1xf32> to vector<8x8xf32>
    %61 = arith.mulf %59, %60 : vector<8x8xf32>
    %62 = vector.extract_strided_slice %3 {offsets = [0, 48], sizes = [8, 16], strides = [1, 1]} : vector<8x64xf32> to vector<8x16xf32>
    %63 = vector.extract_strided_slice %5 {offsets = [0, 48], sizes = [16, 16], strides = [1, 1]} : vector<16x64xf32> to vector<16x16xf32>
    %cst_32 = arith.constant dense<0.000000e+00> : vector<8x16xf32>
    %64 = tpu.matmul %62, %63, %cst_32 {dimension_numbers = #tpu.dot_dimension_numbers<[1], [1], [0], [0], [0, 0, 1, 0], [], []>} : vector<8x16xf32>, vector<16x16xf32>, vector<8x16xf32> -> vector<8x16xf32>
    %c0_33 = arith.constant 0 : index
    %c0_34 = arith.constant 0 : index
    %c0_35 = arith.constant 0 : index
    %c0_36 = arith.constant 0 : index
    %65 = vector.load %arg4[%c0_33, %c0_34, %c0_35, %c0_36] : memref<1x1x8x16xf32, #tpu.memory_space<vmem>>, vector<1x1x8x16xf32>
    %66 = vector.shape_cast %65 : vector<1x1x8x16xf32> to vector<8x16xf32>
    %67 = arith.addf %64, %66 : vector<8x16xf32>
    %cst_37 = arith.constant dense<0xFF800000> : vector<8xf32>
    %68 = vector.multi_reduction <maximumf>, %67, %cst_37 [1] : vector<8x16xf32> to vector<8xf32>
    %69 = vector.shape_cast %68 : vector<8xf32> to vector<8x1xf32>
    %70 = vector.broadcast %69 : vector<8x1xf32> to vector<8x16xf32>
    %71 = arith.subf %67, %70 : vector<8x16xf32>
    %72 = math.exp %71 : vector<8x16xf32>
    %cst_38 = arith.constant dense<0.000000e+00> : vector<8xf32>
    %73 = vector.multi_reduction <add>, %72, %cst_38 [1] : vector<8x16xf32> to vector<8xf32>
    %74 = vector.shape_cast %73 : vector<8xf32> to vector<8x1xf32>
    %75 = tpu.reciprocal %74 : vector<8x1xf32> -> vector<8x1xf32>
    %76 = vector.extract_strided_slice %7 {offsets = [0, 24], sizes = [16, 8], strides = [1, 1]} : vector<16x32xf32> to vector<16x8xf32>
    %cst_39 = arith.constant dense<0.000000e+00> : vector<8x8xf32>
    %77 = tpu.matmul %72, %76, %cst_39 {dimension_numbers = #tpu.dot_dimension_numbers<[1], [0], [0], [1], [0, 0, 1, 1], [], []>} : vector<8x16xf32>, vector<16x8xf32>, vector<8x8xf32> -> vector<8x8xf32>
    %78 = vector.broadcast %75 : vector<8x1xf32> to vector<8x8xf32>
    %79 = arith.mulf %77, %78 : vector<8x8xf32>
    %80 = tpu.concatenate %25, %43, %61, %79 in 1 : vector<8x8xf32>, vector<8x8xf32>, vector<8x8xf32>, vector<8x8xf32> -> vector<8x32xf32>
    %c0_40 = arith.constant 0 : index
    %c0_41 = arith.constant 0 : index
    %81 = vector.load %arg5[%c0_40, %c0_41] : memref<32x32xf32, #tpu.memory_space<vmem>>, vector<32x32xf32>
    %cst_42 = arith.constant dense<0.000000e+00> : vector<8x32xf32>
    %82 = tpu.matmul %80, %81, %cst_42 {dimension_numbers = #tpu.dot_dimension_numbers<[1], [0], [0], [1], [0, 0, 1, 1], [], []>} : vector<8x32xf32>, vector<32x32xf32>, vector<8x32xf32> -> vector<8x32xf32>
    %c0_43 = arith.constant 0 : index
    %c0_44 = arith.constant 0 : index
    %83 = vector.load %arg6[%c0_43, %c0_44] : memref<1x32xf32, #tpu.memory_space<vmem>>, vector<1x32xf32>
    %84 = vector.broadcast %83 : vector<1x32xf32> to vector<8x32xf32>
    %85 = arith.addf %82, %84 : vector<8x32xf32>
    %c0_45 = arith.constant 0 : index
    %c0_46 = arith.constant 0 : index
    %c0_47 = arith.constant 0 : index
    %86 = vector.load %arg7[%c0_45, %c0_46, %c0_47] : memref<1x8x32xf32, #tpu.memory_space<vmem>>, vector<1x8x32xf32>
    %87 = vector.shape_cast %86 : vector<1x8x32xf32> to vector<8x32xf32>
    %88 = vector.shape_cast %85 : vector<8x32xf32> to vector<1x8x32xf32>
    tpu.vector_store %arg7[%c0_45, %c0_46, %c0_47], %88 {strides = array<i32>} : memref<1x8x32xf32, #tpu.memory_space<vmem>>, vector<1x8x32xf32>,
    return
  }
  func.func @transform_0(%arg0: i32) -> (i32, i32, i32) {
    %c0_i32 = arith.constant 0 : i32
    %c0_i32_0 = arith.constant 0 : i32
    %c0_i32_1 = arith.constant 0 : i32
    return %arg0, %c0_i32, %c0_i32_0 : i32, i32, i32
  }
  func.func @transform_1(%arg0: i32) -> (i32, i32, i32) {
    %c0_i32 = arith.constant 0 : i32
    %c0_i32_0 = arith.constant 0 : i32
    %c0_i32_1 = arith.constant 0 : i32
    return %arg0, %c0_i32, %c0_i32_0 : i32, i32, i32
  }
  func.func @transform_2(%arg0: i32) -> (i32, i32, i32) {
    %c0_i32 = arith.constant 0 : i32
    %c0_i32_0 = arith.constant 0 : i32
    %c0_i32_1 = arith.constant 0 : i32
    return %arg0, %c0_i32, %c0_i32_0 : i32, i32, i32
  }
  func.func @transform_3(%arg0: i32) -> (i32, i32, i32, i32) {
    %c0_i32 = arith.constant 0 : i32
    %c0_i32_0 = arith.constant 0 : i32
    %c0_i32_1 = arith.constant 0 : i32
    %c0_i32_2 = arith.constant 0 : i32
    return %arg0, %c0_i32, %c0_i32_0, %c0_i32_1 : i32, i32, i32, i32
  }
  func.func @transform_4(%arg0: i32) -> (i32, i32) {
    %c0_i32 = arith.constant 0 : i32
    %c0_i32_0 = arith.constant 0 : i32
    %c0_i32_1 = arith.constant 0 : i32
    return %c0_i32, %c0_i32_0 : i32, i32
  }
  func.func @transform_5(%arg0: i32) -> (i32, i32) {
    %c0_i32 = arith.constant 0 : i32
    %c0_i32_0 = arith.constant 0 : i32
    %c0_i32_1 = arith.constant 0 : i32
    return %c0_i32, %c0_i32_0 : i32, i32
  }
  func.func @transform_6(%arg0: i32) -> (i32, i32, i32) {
    %c0_i32 = arith.constant 0 : i32
    %c0_i32_0 = arith.constant 0 : i32
    %c0_i32_1 = arith.constant 0 : i32
    return %arg0, %c0_i32, %c0_i32_0 : i32, i32, i32
  }
}

</mosaic_0001>

<bundles_post_ra>
// kernel: tpu_custom_call.1
= control target key start
LH: loop header
LB: loop body
LE: loop exit
PB: predicated region body
PF: predicated region fallthrough
CT: control target
= control target key end

     0   :  { %s1665_s0 = inlined_call_operand.hbm [shape: f32[2,8,64], index: 0, kind: input, shape index: {}]   ;;  %s1666_s1 = inlined_call_operand.hbm [shape: f32[2,16,64], index: 1, kind: input, shape index: {}]   ;;  %s1667_s2 = inlined_call_operand.hbm [shape: f32[2,16,32], index: 2, kind: input, shape index: {}]   ;;  %s1668_s3 = inlined_call_operand.hbm [shape: f32[2,1,8,16], index: 3, kind: input, shape index: {}]   ;;  %s1669_s4 = inlined_call_operand.hbm [shape: f32[32,32], index: 4, kind: input, shape index: {}]   ;;  %s1670_s5 = inlined_call_operand.vmem [shape: f32[1,32], index: 5, kind: input, shape index: {}]   ;;  %s1671_s6 = inlined_call_operand.hbm [shape: f32[2,8,32], index: 6, kind: output, shape index: {}]  }
   0x1   :  { %1686 = sst [smem:[#allocation23_spill]] %s1666_s1 }
   0x2   :  { %1687 = sst [smem:[#allocation24_spill]] %s1669_s4 }
   0x3   :  { %1688 = sst [smem:[#allocation25_spill]] %s1670_s5 }
   0x4   :  { %11 = vsyncpa [#allocation3], 0 }
   0x5   :  { %13 = vsyncpa [#allocation3 + $0x1], 0 }
   0x6   :  { %14 = vsyncpa [#allocation6], 0 }
   0x7   :  { %16 = vsyncpa [#allocation6 + $0x1], 0 }
   0x8   :  { %17 = vsyncpa [#allocation9], 0 }
   0x9   :  { %19 = vsyncpa [#allocation9 + $0x1], 0 }
   0xa   :  { %20 = vsyncpa [#allocation4], 0 }
   0xb   :  { %22 = vsyncpa [#allocation4 + $0x1], 0  ;;  %s1391_s21 = smov 0   ;;  %s1393_s22 = smov 0  }
   0xc   :  { %s1395_s23 = smov 0   ;;  %s1397_s24 = smov 0  }
   0xd LB: > { %1689 = sst [smem:[#allocation17_spill]] %s1331_s21  ;;  %s1412_s25 = sadd.s32 4294967295, %s1343_s24   ;;  %s1343_s24 = sphi %s1397_s24, %s1713_s24   ;;  %s1339_s23 = sphi %s1395_s23, %s1715_s23   ;;  %s1335_s22 = sphi %s1393_s22, %s1717_s22   ;;  %s1331_s21 = sphi %s1391_s21, %s1716_s21  }
   0xe   : > { %1690 = sst [smem:[#allocation18_spill]] %s1339_s23  ;;  %s957_s26 = sadd.s32 4294967294, %s1343_s24  }
   0xf   : > { %p48_p0 = scmp.ne.s32.totalorder %s1335_s22, %s1331_s21  ;;  %p1685_p1 = scmp.eq.s32.totalorder %s1412_s25, 0 }
  0x10   : > { %p192_p2 = scmp.eq.s32.totalorder %s1412_s25, 1  ;;  %p198_p3 = scmp.eq.s32.totalorder %s957_s26, 1 }
  0x11   : > { %p1421_p4 = por %p1685_p1, %p48_p0  ;;  %p958_p5 = scmp.ge.s32.totalorder %s1343_s24, 1 }
  0x12   : > { %p1426_p6 = por %p198_p3, %p48_p0  ;;  %p205_p7 = scmp.lt.s32.totalorder %s1343_s24, 3 }
  0x13   : > { %s1694_s4 = sld [smem:[#allocation24_spill]]  ;;  %s1345_s9 = smov [#allocation10]  }
  0x14   : > { %s1692_s28 = scalar_select %p1426_p6, 1, 0 }
  0x15   : > { %p1434_p8 = pnand %p958_p5, %p205_p7  ;;  %s218_s10 = sshll.u32 %s1345_s9, 4  ;;  %s219_s10 = int_to_ptr.vmem [resolvable:$true] %s218_s10 }
  0x16   : > { %1693 = sst [smem:[#allocation19_spill]] %s1692_s28  ;;  %s1444_s11 = sadd.s32 1, %s1343_s24  }
  0x17   : > { %p1015_p9 = pneg %p1434_p8  ;;  %1696 = sst [smem:[#allocation20_spill]] %s1444_s11 }
  0x18   : > { %s1672_s12 = smov 128   ;;  %s1674_s13 = smov 8  }
  0x19   : > { %s216_s7 = sshll.u32 %s1694_s4, 4  ;;  %p1016_p10 = pnand %p1015_p9, %p1685_p1  ;;  %s217_s7 = int_to_ptr.hbm [resolvable:$true] %s216_s7 }
  0x1a   : > { %s32_s14 = ssub.s32 %s1343_s24, %s1444_s11  ;;  %s35_s15 = sadd.s32 1, %s1339_s23 }
  0x1b   : > { %1018 = dma.hbm_to_vmem [thread:$0]  (!%p1016_p10), %s217_s7, 512, %s219_s10, [#allocation9], %s1672_s12, %s1672_s12, %s1674_s13  }
  0x1c   : > { %p33_p12 = scmp.eq.s32.totalorder %s32_s14, 0  ;;  %p42_p13 = scmp.ne.s32.totalorder %s1339_s23, %s1335_s22 }
  0x1d   : > { %p43_p0 = scmp.eq.s32.totalorder %s1343_s24, 0  ;;  %p1037_p3 = scmp.lt.s32.totalorder %s1343_s24, 2 }
  0x1e   : > { %s1457_s16 = scalar_select %p33_p12, %s1339_s23, %s35_s15  }
  0x1f   : > { %p44_p5 = por %p43_p0, %p42_p13  ;;  %p1461_p7 = por %p192_p2, %p42_p13 }
  0x20   : > { %1697 = sst [smem:[#allocation21_spill]] %s1457_s16  ;;  %s1466_s18 = sand.u32 1, %s1339_s23  }
  0x21   : > { %s1698_s17 = scalar_select %p1461_p7, 1, 0 }
  0x22   : > { %s1676_s19 = sand.u32 1, %s1343_s24   ;;  %p1469_p9 = pnand %p1037_p3, %p44_p5 }
  0x23   : > { %1699 = sst [smem:[#allocation22_spill]] %s1698_s17  ;;  %s963_s26 = sshll.u32 %s1466_s18, 4 }
  0x24   : > { %s999_s29 = sshll.u32 %s1343_s24, 4  ;;  %s1701_s1 = sld [smem:[#allocation23_spill]] }
  0x25   : > { %s258_s10 = scalar_lea.vmem [#allocation5], %s963_s26  ;;  %s1480_s12 = scalar_lea.sflag [#allocation6], %s1676_s19 }
  0x26   : > { %s266_s14 = sshll.u32 %s258_s10, 4  ;;  %p1149_p10 = pneg %p1469_p9  ;;  %s267_s14 = int_to_ptr.vmem [resolvable:$true] %s266_s14 }
  0x2a   : > { %s263_s9 = scalar_lea.hbm %s1701_s1, %s999_s29  ;;  %s1152_s10 = scalar_lea.hbm %s1701_s1, 32 }
  0x2b   : > { %s264_s15 = sshll.u32 %s263_s9, 4  ;;  %s265_s15 = int_to_ptr.hbm [resolvable:$true] %s264_s15 }
  0x2c   : > { %s1145_s13 = sshra.s32 %s265_s15, 4  ;;  %s1146_s13 = int_to_ptr.hbm [resolvable:$true] %s1145_s13 }
  0x2d   : > { %s1147_s4 = scalar_lea.hbm %s1146_s13, 16  ;;  %p1153_p0 = scmp.lt.s32.totalorder %s1146_s13, %s1701_s1 }
  0x2e   : > { %p1148_p2 = scmp.ne.s32.totalorder %s1146_s13, %s1147_s4  ;;  %p1154_p3 = scmp.lt.s32.totalorder %s1152_s10, %s1147_s4 }
  0x30   : > { %p1150_p12 = pnand %p1149_p10, %p1148_p2  ;;  %p1155_p5 = por %p1154_p3, %p1153_p0 }
  0x32   : > { %p1151_p13 = pneg %p1150_p12 }
  0x34   : > { %p1156_p11 = pnand %p1155_p5, %p1151_p13 }
  0x36   : > { %1159 = shalt.err (!%p1156_p11)
}
  0x37   : > { %s1702_s19 = smov 8   ;;  %s1703_s23 = smov 128  }
  0x38   : > { %1025 = dma.hbm_to_vmem [thread:$0]  (!%p1469_p9), %s265_s15, 256, %s267_s14, %s1480_s12, %s1703_s23, %s1703_s23, %s1702_s19  }
  0x39   : > { %s285_s16 = scalar_lea.hbm %s1667_s2, %s999_s29  ;;  %s280_s13 = scalar_lea.vmem [#allocation7], %s963_s26 }
  0x3a   : > { %s288_s4 = sshll.u32 %s280_s13, 4  ;;  %s286_s10 = sshll.u32 %s285_s16, 4  ;;  %s1502_s4 = int_to_ptr.vmem [resolvable:$true] %s288_s4  ;;  %s1504_s10 = int_to_ptr.hbm [resolvable:$true] %s286_s10 }
  0x3b   : > { %s1682_s9 = sshll.u32 %s1466_s18, 3  ;;  %s962_s1 = sshll.u32 %s1343_s24, 3 }
  0x3c   : > { %s243_s21 = scalar_lea.hbm %s1665_s0, %s962_s1  ;;  %s239_s14 = scalar_lea.vmem [#allocation2], %s1682_s9 }
  0x3d   : > { %s245_s5 = sshll.u32 %s243_s21, 4  ;;  %s247_s15 = sshll.u32 %s239_s14, 4  ;;  %s246_s5 = int_to_ptr.hbm [resolvable:$true] %s245_s5  ;;  %s248_s15 = int_to_ptr.vmem [resolvable:$true] %s247_s15 }
  0x3e   : > { %s236_s26 = scalar_lea.sflag [#allocation3], %s1466_s18  ;;  %s1175_s29 = sshra.s32 %s246_s5, 4  ;;  %s1176_s29 = int_to_ptr.hbm [resolvable:$true] %s1175_s29 }
  0x3f   : > { %s1177_s30 = scalar_lea.hbm %s1176_s29, 8  ;;  %s1182_s28 = scalar_lea.hbm %s1665_s0, 16 }
  0x40   : > { %p1178_p11 = scmp.ne.s32.totalorder %s1176_s29, %s1177_s30  ;;  %p1183_p13 = scmp.lt.s32.totalorder %s1176_s29, %s1665_s0 }
  0x41   : > { %p1184_p0 = scmp.lt.s32.totalorder %s1182_s28, %s1177_s30 }
  0x42   : > { %p1180_p2 = pnand %p1178_p11, %p1149_p10 }
  0x43   : > { %p1185_p3 = por %p1184_p0, %p1183_p13 }
  0x44   : > { %p1181_p12 = pneg %p1180_p2 }
  0x46   : > { %p1186_p5 = pnand %p1185_p3, %p1181_p12 }
  0x48   : > { %1189 = shalt.err (!%p1186_p5)
}
  0x49   : > { %1022 = dma.hbm_to_vmem [thread:$0]  (!%p1469_p9), %s246_s5, 128, %s248_s15, %s236_s26  }
  0x4a   : > { %s306_s9 = scalar_lea.hbm %s1668_s3, %s962_s1  ;;  %s1205_s17 = sshra.s32 %s1504_s10, 4  ;;  %s1206_s17 = int_to_ptr.hbm [resolvable:$true] %s1205_s17 }
  0x4b   : > { %s1207_s7 = scalar_lea.hbm %s1206_s17, 16  ;;  %s1212_s16 = scalar_lea.hbm %s1667_s2, 32 }
  0x4c   : > { %p1208_p11 = scmp.ne.s32.totalorder %s1206_s17, %s1207_s7  ;;  %p1213_p12 = scmp.lt.s32.totalorder %s1206_s17, %s1667_s2 }
  0x4d   : > { %p1214_p13 = scmp.lt.s32.totalorder %s1212_s16, %s1207_s7 }
  0x4e   : > { %p1210_p2 = pnand %p1208_p11, %p1149_p10 }
  0x4f   : > { %p1215_p0 = por %p1214_p13, %p1213_p12 }
  0x50   : > { %p1211_p1 = pneg %p1210_p2 }
  0x52   : > { %p1216_p3 = pnand %p1215_p0, %p1211_p1 }
  0x54   : > { %1219 = shalt.err (!%p1216_p3)
}
  0x55   : > { %1028 = dma.hbm_to_vmem [thread:$0]  (!%p1469_p9), %s1504_s10, 256, %s1502_s4, %s1480_s12, %s1703_s23, %s1703_s23, %s1702_s19  }
  0x56   : > { %s308_s1 = sshll.u32 %s306_s9, 4  ;;  %s1704_s5 = sshll.u32 %s1466_s18, 3  ;;  %s309_s1 = int_to_ptr.hbm [resolvable:$true] %s308_s1 }
  0x57   : > { %s302_s17 = scalar_lea.vmem [#allocation8], %s1704_s5  ;;  %s1705_s26 = sand.u32 1, %s1343_s24  }
  0x58   : > { %s310_s15 = sshll.u32 %s302_s17, 4  ;;  %s299_s21 = scalar_lea.sflag [#allocation9], %s1705_s26  ;;  %s311_s15 = int_to_ptr.vmem [resolvable:$true] %s310_s15 }
  0x59   : > { %s1235_s13 = sshra.s32 %s309_s1, 4  ;;  %s1242_s23 = scalar_lea.hbm %s1668_s3, 16  ;;  %s1236_s13 = int_to_ptr.hbm [resolvable:$true] %s1235_s13 }
  0x5a   : > { %s1237_s14 = scalar_lea.hbm %s1236_s13, 8  ;;  %p1243_p2 = scmp.lt.s32.totalorder %s1236_s13, %s1668_s3 }
  0x5b   : > { %p1238_p1 = scmp.ne.s32.totalorder %s1236_s13, %s1237_s14  ;;  %p1244_p12 = scmp.lt.s32.totalorder %s1242_s23, %s1237_s14 }
  0x5d   : > { %p1240_p5 = pnand %p1238_p1, %p1149_p10  ;;  %p1245_p13 = por %p1244_p12, %p1243_p2 }
  0x5f   : > { %p1241_p11 = pneg %p1240_p5 }
  0x61   : > { %p1246_p0 = pnand %p1245_p13, %p1241_p11 }
  0x63   : > { %1249 = shalt.err (!%p1246_p0)
}
  0x64   : > { %1031 = dma.hbm_to_vmem [thread:$0]  (!%p1469_p9), %s309_s1, 128, %s311_s15, %s299_s21  }
  0x65   : > { %319 = sbr.rel (%p1434_p8) target bundleno = 1004 (0x3ec), region = 44  ;;  %s1564_s18 = sand.u32 (!%p1434_p8), 1, %s1335_s22  }
  0x66   : > { %s1567_s4 = sshll.u32 (!%p1434_p8), %s1564_s18, 3  ;;  %s322_s10 = scalar_lea.sflag (!%p1434_p8), [#allocation3], %s1564_s18 }
  0x67   : > { %s325_s9 = scalar_lea.vmem (!%p1434_p8), [#allocation2], %s1567_s4 }
  0x6a   : > { %1310 = dma.done.wait (%p1421_p4), %s322_s10, 128  }
  0x6b   : > { %1312 = vsyncadd (%p1421_p4), %s322_s10, 4294967168  ;;  %s331_s8 = sand.u32 1, %s1412_s25   ;;  %s973_s20 = sshll.u32 %s1564_s18, 4 }
  0x6c   : > { %s332_s30 = scalar_lea.sflag [#allocation6], %s331_s8  ;;  %s335_s16 = scalar_lea.vmem [#allocation5], %s973_s20 }
  0x6d   : > { %1314 = dma.done.wait (%p1421_p4), %s332_s30, 512  }
  0x6e   : > { %1316 = vsyncadd (%p1421_p4), %s332_s30, 4294966784  ;;  %s1581_s28 = scalar_lea.vmem [#allocation7], %s973_s20  ;;  %s352_s11 = scalar_lea.sflag [#allocation9], %s331_s8 }
  0x6f   : > { %s355_s1 = scalar_lea.vmem [#allocation8], %s1567_s4 }
  0x70   : > { %1318 = dma.done.wait (%p1421_p4), %s352_s11, 128  }
  0x71   : > { %1320 = vsyncadd (%p1421_p4), %s352_s11, 4294967168  ;;  %p1706_p8 = scmp.eq.s32.totalorder %s1412_s25, 0 }
  0x73   : > { %1322 = dma.done.wait (%p1706_p8), [#allocation9], 512   ;;  %p1707_p9 = pmov %p1706_p8 }
  0x74   : > { %vm412_vm0 = vcmask 130048   ;;  %v408_v0 = vld [vmem:[%s335_s16 + $0x8] sm:$0xff]  ;;  %v407_v1 = vld [vmem:[%s335_s16] sm:$0xff]  ;;  %s1348_s5 = smov 96   ;;  %s1349_s17 = smov 112  }
  0x75   : > { %1324 = vsyncadd (%p1707_p9), [#allocation9], 4294966784  ;;  %580 = vrot.lane.b32.xlu2 %v408_v0, %s1348_s5  ;;  %978 = vmatpush.xpose.msk.msra.mxu0 %vm412_vm0, %v408_v0  ;;  %v405_v2 = vld [vmem:[%s325_s9] sm:$0xff]  ;;  %s1350_s27 = smov 80   ;;  %v409_v8 = vld [vmem:[%s1581_s28] sm:$0xff]  ;;  %s1351_s15 = smov 120  }
  0x76   : > { %491 = vrot.lane.b32.xlu1 %v407_v1, %s1349_s17  ;;  %493 = vrot.lane.b32.xlu0 %v408_v0, %s1349_s17  ;;  %v406_v3 = vmul.f32 0.25, %v405_v2  ;;  %v410_v6 = vld [vmem:[%s1581_s28 + $0x8] sm:$0xff]  ;;  %v411_v13 = vld [vmem:[%s355_s1] sm:$0xff]  ;;  %s1352_s26 = smov 104   ;;  %s1353_s21 = smov 24  }
  0x77   : > { %482 = vmatpush.msra.mxu1 %v410_v6  ;;  %v1083_v17 = vpack.i.bf16 %v409_v8, %v410_v6  ;;  %s1354_s13 = smov 8   ;;  %s1355_s14 = smov 16  }
  0x78   : > { %s996_s7 = sshll.u32 %s1412_s25, 3  ;;  %s1709_s8 = sld [smem:[#allocation25_spill]] }
  0x79   : > { %979 = vmatpush.xpose.msk.msra.mxu0 %vm412_vm0, %v407_v1  ;;  %483 = vmatpush.msra.mxu1 %v409_v8  ;;  %s807_s19 = scalar_lea.hbm %s1671_s6, %s996_s7  ;;  %s404_s20 = scalar_lea.vmem [#allocation11], %s1567_s4 }
  0x7a   : > { %s809_s30 = sshll.u32 %s404_s20, 4  ;;  %s811_s16 = sshll.u32 %s807_s19, 4  ;;  %s810_s30 = int_to_ptr.vmem [resolvable:$true] %s809_s30  ;;  %s812_s16 = int_to_ptr.hbm [resolvable:$true] %s811_s16 }
  0x7b   : > { %s797_s28 = scalar_lea.sflag [#allocation4], %s1564_s18  ;;  %s1279_s11 = sshra.s32 %s812_s16, 4  ;;  %s1280_s11 = int_to_ptr.hbm [resolvable:$true] %s1279_s11 }
  0x7c   : > { %980 = vmatmul.msk.f32.vlgmr.msra.gmra.mxu0 %vm412_vm0, %v406_v3  ;;  %s1281_s25 = scalar_lea.hbm %s1280_s11, 8  ;;  %p1286_p1 = scmp.lt.s32.totalorder %s1280_s11, %s1671_s6 }
  0x7d   : > { %665 = vrot.lane.b32.xlu2 %v408_v0, %s1350_s27  ;;  %p1282_p4 = scmp.ne.s32.totalorder %s1280_s11, %s1281_s25 }
  0x7e   : > { %489 = vrot.lane.b32.xlu1 %v406_v3, %s1349_s17 }
  0x7f   : > { %p1283_p10 = pnand %p1282_p4, %p1461_p7 }
  0x81   : > { %p1284_p3 = pneg %p1283_p10 }
  0x85   : > { %663 = vrot.lane.b32.xlu2 %v407_v1, %s1350_s27 }
  0x86   : > { %578 = vrot.lane.b32.xlu1 %v407_v1, %s1348_s5 }
  0x8d   : > { %661 = vrot.lane.b32.xlu2 %v406_v3, %s1350_s27 }
  0x8e   : > { %576 = vrot.lane.b32.xlu1 %v406_v3, %s1348_s5 }
  0xcf   : > { %v581_v4 = vpop.permute.xlu2 %580 }
  0xd0   : > { %986 = vmatpush.xpose.msk.msrb.mxu1 %vm412_vm0, %v581_v4 }
  0xd7   : > { %v666_v5 = vpop.permute.xlu2 %665 }
  0xd8   : > { %990 = vmatpush.xpose.msk.msrb.mxu0 %vm412_vm0, %v666_v5 }
  0xdf   : > { %v664_v7 = vpop.permute.xlu2 %663 }
  0xe0   : > { %991 = vmatpush.xpose.msk.msrb.mxu0 %vm412_vm0, %v664_v7 }
  0xe7   : > { %v662_v9 = vpop.permute.xlu2 %661 }
  0xe8   : > { %v492_v10 = vpop.permute.xlu1 %491  ;;  %v494_v11 = vpop.permute.xlu0 %493  ;;  %992 = vmatmul.msk.f32.vlgmr.msrb.gmra.mxu0 %vm412_vm0, %v662_v9 }
  0xe9   : > { %982 = vmatpush.xpose.msk.msra.mxu2 %vm412_vm0, %v494_v11 }
  0xed   : > { %983 = vmatpush.xpose.msk.msra.mxu2 %vm412_vm0, %v492_v10 }
  0xf0   : > { %v490_v12 = vpop.permute.xlu1 %489 }
  0xf1   : > { %984 = vmatmul.msk.f32.vlgmr.msra.gmra.mxu2 %vm412_vm0, %v490_v12 }
  0xf8   : > { %v579_v18 = vpop.permute.xlu1 %578 }
  0xf9   : > { %v439_v14 = vpop.f32.mrf.mxu0  ;;  %987 = vmatpush.xpose.msk.msrb.mxu1 %vm412_vm0, %v579_v18 }
  0xfa   : > { %v440_v15 = vadd.f32 %v439_v14, %v411_v13 }
  0xfc   : > { %v442_v16 = vsel %vm412_vm0, %v440_v15, -inf }
  0xfd   : > { %443 = vmax.xlane.f32.xlu0 %v442_v16 }
 0x100   : > { %v577_v29 = vpop.permute.xlu1 %576 }
 0x111   : > { %1084 = vrot.lane.b32.xlu0 %v1083_v17, %s1351_s15 }
 0x165   : > { %v690_v19 = vpop.f32.mrf.mxu0 }
 0x166   : > { %v691_v20 = vadd.f32 %v690_v19, %v411_v13 }
 0x168   : > { %v693_v21 = vsel %vm412_vm0, %v691_v20, -inf }
 0x169   : > { %694 = vmax.xlane.f32.xlu0 %v693_v21 }
 0x170   : > { %v444_v22 = vpop.xlane.xlu0 %443 }
 0x171   : > { %v445_v23 = vsub.f32 %v440_v15, %v444_v22 }
 0x173   : > { %v446_v24 = vmul.f32 1.442695, %v445_v23 }
 0x174   : > { %v518_v25 = vpop.f32.mrf.mxu2 }
 0x175   : > { %1099 = vpow2.f32 %v446_v24  ;;  %v519_v26 = vadd.f32 %v518_v25, %v411_v13 }
 0x177   : > { %v521_v27 = vsel %vm412_vm0, %v519_v26, -inf }
 0x178   : > { %522 = vmax.xlane.f32.xlu1 %v521_v27 }
 0x17b   : > { %v1100_v28 = vpop.eup %1099 }
 0x17c   : > { %981 = vmatmul.msk.f32.vlgmr.msra.gmra.mxu1 %vm412_vm0, %v1100_v28  ;;  %v448_v41 = vsel %vm412_vm0, %v1100_v28, 0.0 }
 0x183   : > { %v1085_v30 = vpop.permute.xlu0 %1084 }
 0x184   : > { %988 = vmatmul.msk.f32.vlgmr.msrb.gmra.mxu1 %vm412_vm0, %v577_v29  ;;  %v1086_v31 = vunpack.i.l.bf16 %v1085_v30  ;;  %v1087_v32 = vunpack.i.h.bf16 %v1085_v30 }
 0x186   : > { %569 = vmatpush.msra.mxu3 %v1086_v31 }
 0x188   : > { %570 = vmatpush.msra.mxu3 %v1087_v32 }
 0x191   : > { %1094 = vrot.lane.b32.xlu1 %v1083_v17, %s1352_s26 }
 0x1dc   : > { %v695_v33 = vpop.xlane.xlu0 %694 }
 0x1dd   : > { %v696_v34 = vsub.f32 %v691_v20, %v695_v33 }
 0x1df   : > { %v697_v35 = vmul.f32 1.442695, %v696_v34  ;;  %v766_v34 = vld [vmem:[#allocation10 + $0x18] sm:$0xff] }
 0x1e0   : > { %787 = vmatpush.msra.mxu1 %v766_v34 }
 0x1e1   : > { %1101 = vpow2.f32 %v697_v35  ;;  %v765_v35 = vld [vmem:[#allocation10 + $0x10] sm:$0xff] }
 0x1e2   : > { %788 = vmatpush.msra.mxu1 %v765_v35 }
 0x1e7   : > { %v1102_v36 = vpop.eup %1101 }
 0x1e8   : > { %v699_v37 = vsel %vm412_vm0, %v1102_v36, 0.0 }
 0x1e9   : > { %700 = vadd.xlane.f32.xlu0 %v699_v37 }
 0x1eb   : > { %v523_v38 = vpop.xlane.xlu1 %522 }
 0x1ec   : > { %v524_v39 = vsub.f32 %v519_v26, %v523_v38  ;;  %v763_v38 = vld [vmem:[#allocation10] sm:$0xff] }
 0x1ee   : > { %v525_v40 = vmul.f32 1.442695, %v524_v39 }
 0x1f0   : > { %1103 = vpow2.f32 %v525_v40 }
 0x1f1   : > { %449 = vadd.xlane.f32.xlu0 %v448_v41 }
 0x1f6   : > { %v1104_v42 = vpop.eup %1103 }
 0x1f7   : > { %985 = vmatmul.msk.f32.vlgmr.msra.gmra.mxu3 %vm412_vm0, %v1104_v42  ;;  %v527_v50 = vsel %vm412_vm0, %v1104_v42, 0.0 }
 0x1f9   : > { %v1618_v43 = vpop.f32.mrf.mxu1 }
 0x201   : > { %v605_v44 = vpop.f32.mrf.mxu1 }
 0x202   : > { %v606_v45 = vadd.f32 %v605_v44, %v411_v13 }
 0x203   : > { %v1095_v46 = vpop.permute.xlu1 %1094 }
 0x204   : > { %v1096_v47 = vunpack.i.l.bf16 %v1095_v46  ;;  %v608_v48 = vsel %vm412_vm0, %v606_v45, -inf  ;;  %v1097_v49 = vunpack.i.h.bf16 %v1095_v46 }
 0x205   : > { %609 = vmax.xlane.f32.xlu2 %v608_v48 }
 0x206   : > { %739 = vmatpush.msrb.mxu2 %v1096_v47 }
 0x208   : > { %740 = vmatpush.msrb.mxu2 %v1097_v49 }
 0x209   : > { %993 = vmatmul.msk.f32.vlgmr.msrb.gmra.mxu2 %vm412_vm0, %v1102_v36  ;;  %v764_v36 = vld [vmem:[#allocation10 + $0x8] sm:$0xff] }
 0x20a   : > { %789 = vmatpush.msra.mxu1 %v764_v36 }
 0x20c   : > { %790 = vmatpush.msra.mxu1 %v763_v38 }
 0x21d   : > { %1089 = vrot.lane.b32.xlu2 %v1083_v17, %s1349_s17  ;;  %s1285_s17 = scalar_lea.hbm %s1671_s6, 16 }
 0x21e   : > { %p1287_p5 = scmp.lt.s32.totalorder %s1285_s17, %s1281_s25 }
 0x220   : > { %p1288_p11 = por %p1287_p5, %p1286_p1 }
 0x222   : > { %p1289_p2 = pnand %p1288_p11, %p1284_p3 }
 0x246   : > { %528 = vadd.xlane.f32.xlu2 %v527_v50 }
 0x25c   : > { %v701_v54 = vpop.xlane.xlu0 %700 }
 0x25d   : > { %vm707_vm1 = vweird.f32 %v701_v54  ;;  %v713_v0 = vand.u32 2147483648, %v701_v54  ;;  %v711_v2 = vand.u32 2147483647, %v701_v54 }
 0x25f   : > { %v714_v3 = vor.u32 1.1754944e-38, %v713_v0  ;;  %vm712_vm4 = vcmp.eq.f32.partialorder %v711_v2, 8.507059e+37 }
 0x264   : > { %v450_v37 = vpop.xlane.xlu0 %449 }
 0x265   : > { %vm456_vm14 = vweird.f32 %v450_v37  ;;  %v460_v46 = vand.u32 2147483647, %v450_v37 }
 0x278   : > { %v610_v51 = vpop.xlane.xlu2 %609 }
 0x279   : > { %v611_v52 = vsub.f32 %v606_v45, %v610_v51  ;;  %v462_v45 = vand.u32 2147483648, %v450_v37 }
 0x27a   : > { %v572_v18 = vpop.f32.mrf.mxu3 }
 0x27b   : > { %v612_v53 = vmul.f32 1.442695, %v611_v52  ;;  %v463_v48 = vor.u32 1.1754944e-38, %v462_v45 }
 0x27d   : > { %1105 = vpow2.f32 %v612_v53 }
 0x27e   : > { %1107 = vrcp.f32 %v701_v54 }
 0x280   : > { %v1090_v55 = vpop.permute.xlu2 %1089 }
 0x281   : > { %v1091_v56 = vunpack.i.l.bf16 %v1090_v55  ;;  %v1092_v58 = vunpack.i.h.bf16 %v1090_v55 }
 0x283   : > { %v1106_v57 = vpop.eup %1105  ;;  %654 = vmatpush.msrb.mxu3 %v1091_v56 }
 0x284   : > { %v614_v59 = vsel %vm412_vm0, %v1106_v57, 0.0  ;;  %v1108_v60 = vpop.eup %1107 }
 0x285   : > { %615 = vadd.xlane.f32.xlu1 %v614_v59  ;;  %655 = vmatpush.msrb.mxu3 %v1092_v58  ;;  %v703_v61 = vmul.f32 %v1108_v60, %v701_v54  ;;  %vm708_vm2 = vweird.f32 %v1108_v60 }
 0x286   : > { %989 = vmatmul.msk.f32.vlgmr.msrb.gmra.mxu3 %vm412_vm0, %v1106_v57  ;;  %vm709_vm3 = vmor %vm707_vm1, %vm708_vm2  ;;  %vm461_vm1 = vcmp.eq.f32.partialorder %v460_v46, 8.507059e+37  ;;  %vm758_vm2 = vcmask 64512  }
 0x287   : > { %v704_v62 = vsub.f32 1.0, %v703_v61 }
 0x289   : > { %v705_v63 = vmul.f32 %v1108_v60, %v704_v62 }
 0x28b   : > { %v706_v1 = vadd.f32 %v1108_v60, %v705_v63 }
 0x28c   : > { %v742_v5 = vpop.f32.mrf.mxu2 }
 0x28d   : > { %v710_v4 = vsel %vm709_vm3, %v1108_v60, %v706_v1  ;;  %vm761_vm3 = vcmask 195584  }
 0x28e   : > { %v715_v6 = vsel %vm712_vm4, %v714_v3, %v710_v4  ;;  %vm771_vm4 = vcmask 261120  }
 0x28f   : > { %v745_v7 = vmul.f32 %v742_v5, %v715_v6 }
 0x29e   : > { %755 = vrot.lane.b32.xlu1 %v745_v7, %s1353_s21 }
 0x2b9   : > { %v529_v8 = vpop.xlane.xlu2 %528 }
 0x2ba   : > { %1109 = vrcp.f32 %v529_v8  ;;  %v541_v12 = vand.u32 2147483648, %v529_v8  ;;  %v539_v14 = vand.u32 2147483647, %v529_v8  ;;  %vm535_vm6 = vweird.f32 %v529_v8 }
 0x2bc   : > { %v542_v16 = vor.u32 1.1754944e-38, %v541_v12  ;;  %vm540_vm8 = vcmp.eq.f32.partialorder %v539_v14, 8.507059e+37 }
 0x2c0   : > { %v1110_v9 = vpop.eup %1109 }
 0x2c1   : > { %v531_v10 = vmul.f32 %v1110_v9, %v529_v8  ;;  %vm536_vm5 = vweird.f32 %v1110_v9 }
 0x2c2   : > { %vm537_vm7 = vmor %vm535_vm6, %vm536_vm5 }
 0x2c3   : > { %v532_v11 = vsub.f32 1.0, %v531_v10 }
 0x2c5   : > { %v533_v13 = vmul.f32 %v1110_v9, %v532_v11 }
 0x2c7   : > { %v534_v15 = vadd.f32 %v1110_v9, %v533_v13 }
 0x2c9   : > { %v538_v17 = vsel %vm537_vm7, %v1110_v9, %v534_v15 }
 0x2ca   : > { %v543_v19 = vsel %vm540_vm8, %v542_v16, %v538_v17 }
 0x2cb   : > { %v575_v20 = vmul.f32 %v572_v18, %v543_v19 }
 0x2cd   : > { %747 = vrot.lane.b32.xlu0 %v575_v20, %s1354_s13 }
 0x2f8   : > { %v616_v21 = vpop.xlane.xlu1 %615 }
 0x2f9   : > { %1111 = vrcp.f32 %v616_v21  ;;  %v628_v25 = vand.u32 2147483648, %v616_v21  ;;  %v626_v27 = vand.u32 2147483647, %v616_v21  ;;  %vm622_vm10 = vweird.f32 %v616_v21 }
 0x2fa   : > { %1113 = vrcp.f32 %v450_v37 }
 0x2fb   : > { %v629_v29 = vor.u32 1.1754944e-38, %v628_v25  ;;  %vm627_vm12 = vcmp.eq.f32.partialorder %v626_v27, 8.507059e+37 }
 0x2ff   : > { %v1112_v22 = vpop.eup %1111 }
 0x300   : > { %v618_v23 = vmul.f32 %v1112_v22, %v616_v21  ;;  %vm623_vm9 = vweird.f32 %v1112_v22  ;;  %v1114_v39 = vpop.eup %1113 }
 0x301   : > { %vm624_vm11 = vmor %vm622_vm10, %vm623_vm9  ;;  %v452_v40 = vmul.f32 %v1114_v39, %v450_v37  ;;  %vm457_vm13 = vweird.f32 %v1114_v39 }
 0x302   : > { %v619_v24 = vsub.f32 1.0, %v618_v23  ;;  %vm458_vm15 = vmor %vm456_vm14, %vm457_vm13 }
 0x303   : > { %v453_v41 = vsub.f32 1.0, %v452_v40 }
 0x304   : > { %v620_v26 = vmul.f32 %v1112_v22, %v619_v24 }
 0x305   : > { %v454_v42 = vmul.f32 %v1114_v39, %v453_v41 }
 0x306   : > { %v621_v28 = vadd.f32 %v1112_v22, %v620_v26 }
 0x307   : > { %v455_v44 = vadd.f32 %v1114_v39, %v454_v42 }
 0x308   : > { %v625_v30 = vsel %vm624_vm11, %v1112_v22, %v621_v28 }
 0x309   : > { %v630_v31 = vsel %vm627_vm12, %v629_v29, %v625_v30  ;;  %v657_v32 = vpop.f32.mrf.mxu3  ;;  %v459_v47 = vsel %vm458_vm15, %v1114_v39, %v455_v44 }
 0x30a   : > { %v660_v33 = vmul.f32 %v657_v32, %v630_v31  ;;  %v464_v49 = vsel %vm461_vm1, %v463_v48, %v459_v47 }
 0x30b   : > { %v488_v51 = vmul.f32 %v1618_v43, %v464_v49  ;;  %v1098_v43 = vld [vmem:[%s1709_s8] ss:$0 sm:$0xff] }
 0x30c   : > { %751 = vrot.lane.b32.xlu2 %v660_v33, %s1355_s14 }
 0x310   : > { %v756_v54 = vpop.permute.xlu1 %755 }
 0x33f   : > { %v748_v50 = vpop.permute.xlu0 %747 }
 0x340   : > { %v759_v52 = vsel %vm758_vm2, %v488_v51, %v748_v50 }
 0x366   : > { %v752_v53 = vpop.permute.xlu2 %751 }
 0x367   : > { %v760_v55 = vsel %vm412_vm0, %v759_v52, %v752_v53 }
 0x368   : > { %v762_v56 = vsel %vm761_vm3, %v760_v55, %v756_v54 }
 0x369   : > { %994 = vmatmul.msk.f32.vlgmr.msra.gmra.mxu1 %vm771_vm4, %v762_v56 }
 0x3e6   : > { %v792_v57 = vpop.f32.mrf.mxu1 }
 0x3e7   : > { %v793_v58 = vadd.f32 %v1098_v43, %v792_v57 }
 0x3e9   : > { %795 = vst.msk [vmem:[%s404_s20] sm:$0xff] %vm771_vm4, %v793_v58 }
 0x3ea   : > { %1292 = shalt.err (!%p1289_p2)
}
 0x3eb   : > { %1013 = dma.vmem_to_hbm [thread:$0]  (%p1461_p7), %s810_s30, 128, %s812_s16, %s797_s28  }
 0x3ec PF: > { %s1710_s18 = sld [smem:[#allocation17_spill]]  ;;  %p1712_p12 = scmp.ge.s32.totalorder %s1343_s24, 2 }
 0x3ee   : > { %p1033_p13 = pnand %p1712_p12, %p1426_p6 }
 0x3f0   : > { %p1034_p0 = pneg %p1033_p13 }
 0x3f2   : > { %s823_s26 = sand.u32 1, %s1710_s18  }
 0x3f3   : > { %s824_s21 = scalar_lea.sflag [#allocation4], %s823_s26 }
 0x3f4   : > { %1326 = dma.done.wait (%p1034_p0), %s824_s21, 128  }
 0x3f5   : > { %1328 = vsyncadd (%p1034_p0), %s824_s21, 4294967168  ;;  %s1713_s24 = sld [smem:[#allocation20_spill]]  ;;  %s1716_s21 = smov %s1335_s22 }
 0x3f6   : > { %s1714_s13 = sld [smem:[#allocation18_spill]] }
 0x3f7   : > { %s1715_s23 = sld [smem:[#allocation21_spill]] }
 0x3fb   : > { %p25_p8 = scmp.ge.s32.totalorder %s1713_s24, 4  }
 0x3fc   : > { %s1717_s22 = smov %s1714_s13 }
 0x3fd   :  { %27 = sbr.rel (!%p25_p8) target bundleno = 13 (0xd), region = 130 }
 0x402   :  { %830 = vsyncpa [#allocation3], 1 }
 0x403   :  { %832 = vsyncpa [#allocation3 + $0x1], 1 }
 0x404   :  { %833 = vsyncpa [#allocation6], 1 }
 0x405   :  { %835 = vsyncpa [#allocation6 + $0x1], 1 }
 0x406   :  { %836 = vsyncpa [#allocation9], 1 }
 0x407   :  { %838 = vsyncpa [#allocation9 + $0x1], 1 }
 0x408   :  { %839 = vsyncpa [#allocation4], 1 }
 0x409   :  { %841 = vsyncpa [#allocation4 + $0x1], 1 }

</bundles_post_ra>
